<compile_context>
chip_gen: v6e
topology: v6e:2x2x1
jax: 0.10.0
libtpu: 0.0.40
codegen_flags: <defaults>
</compile_context>

<pallas_src>
import jax
import jax.numpy as jnp
from jax.experimental import pallas as pl
from jax.experimental.pallas import tpu as pltpu


def cls_head_kernel(x_ref, w_ref, b_ref, o_ref):
    """x_ref: [TB, H] VMEM   w_ref: [2, H] VMEM (PyTorch layout)
    b_ref: [2] SMEM          o_ref: [TB, 2] VMEM."""
    # (TB,H) x (2,H)^T -> (TB,2) with f32 accumulation (transposed-RHS MXU form).
    y = jax.lax.dot_general(
        x_ref[...], w_ref[...],
        dimension_numbers=(((1,), (1,)), ((), ())),
        preferred_element_type=jnp.float32)                   # [TB, 2]
    # Bias from SMEM scalars; out_features is hard-coded to 2 by the module
    # (nn.Linear(nb_feature, 2)), so a 2-way select builds the bias row.
    col = jax.lax.broadcasted_iota(jnp.int32, y.shape, 1)
    y = y + jnp.where(col == 0, b_ref[0], b_ref[1])
    o_ref[...] = y.astype(o_ref.dtype)


def my_model_cls_head(last_hidden_state, weight, bias, *, tb=None):
    """last_hidden_state: [B, S, H] f32; weight: [2, H] f32 (PyTorch layout);
    bias: [2] f32.  Returns logits [B, 2] f32."""
    B, S, H = last_hidden_state.shape

    # CLS extraction in the wrapper: only the [B, H] slice ever reaches the
    # kernel / VMEM (avoids DMAing the full [B, S, H] tensor and avoids a
    # (B, 1, H) block that would violate the (8,128) block rule).
    x_cls = last_hidden_state[:, 0, :]                        # [B, H]

    if tb is None:
        # Toy / small B: one full-array block. Large B: tile in multiples of 8
        # so the batch axis pipelines and shards across cores.
        tb = B if B <= 256 else 256
    grid = (pl.cdiv(B, tb),)

    return pl.pallas_call(
        cls_head_kernel,
        out_shape=jax.ShapeDtypeStruct((B, 2), jnp.float32),
        grid_spec=pltpu.PrefetchScalarGridSpec(
            num_scalar_prefetch=0,
            grid=grid,
            in_specs=[
                pl.BlockSpec((tb, H), lambda i: (i, 0)),          # CLS activations
                pl.BlockSpec((2, H), lambda i: (0, 0)),           # weight, lane-dense
                pl.BlockSpec(memory_space=pltpu.MemorySpace.SMEM),  # bias scalars
            ],
            out_specs=pl.BlockSpec((tb, 2), lambda i: (i, 0)),
        ),
        compiler_params=pltpu.CompilerParams(
            dimension_semantics=("parallel",)),                   # shards across TCs (v7x)
    )(x_cls, weight, bias)


if __name__ == "__main__":
    # mode != 'large'  ->  nb_feature = 768
    B, S, H = 2, 8, 768

    key = jax.random.PRNGKey(0)
    k_x, k_w, k_b = jax.random.split(key, 3)

    # TODO(synk): the HuggingFace nlp_model backbone has no in-script Pallas
    # equivalent; its output last_hidden_state is synthesized as input.
    last_hidden_state = jax.random.normal(k_x, (B, S, H), dtype=jnp.float32)

    # nn.Linear(768, 2) default init: U(-1/sqrt(H), 1/sqrt(H)) — deterministic.
    bound = 1.0 / (H ** 0.5)
    weight = jax.random.uniform(k_w, (2, H), minval=-bound, maxval=bound,
                                dtype=jnp.float32)
    bias = jax.random.uniform(k_b, (2,), minval=-bound, maxval=bound,
                              dtype=jnp.float32)

    y = my_model_cls_head(last_hidden_state, weight, bias)
    y = jax.block_until_ready(y)

    # Reference check against plain JAX (same math as the PyTorch forward).
    y_ref = last_hidden_state[:, 0] @ weight.T + bias
    assert y.shape == (B, 2)
    assert jnp.allclose(y, y_ref, atol=1e-4, rtol=1e-4)

    print("KERNEL_OK")
</pallas_src>

<mosaic_0001>
module attributes {stable_mosaic.version = 11 : i64} {
  func.func @cls_head_kernel(%arg0: i32, %arg1: memref<2x768xf32, #tpu.memory_space<vmem>>, %arg2: memref<2x768xf32, #tpu.memory_space<vmem>>, %arg3: memref<2xf32, #tpu.memory_space<smem>>, %arg4: memref<2x2xf32, #tpu.memory_space<vmem>>) attributes {dimension_semantics = [#tpu.dimension_semantics<parallel>], iteration_bounds = array<i64: 1>, scalar_prefetch = 0 : i64, scratch_operands = 0 : i64, tpu.core_type = #tpu.core_type<tc>, window_params = [{transform_indices = @transform_0, window_bounds = array<i64: 2, 768>}, {pipeline_mode = #tpu.pipeline_mode<synchronous>, transform_indices = @transform_1, window_bounds = array<i64: 2, 768>}, {transform_indices = @transform_2, window_bounds = array<i64: 2>}, {transform_indices = @transform_3, window_bounds = array<i64: 2, 2>}]} {
    %c0 = arith.constant 0 : index
    %c0_0 = arith.constant 0 : index
    %0 = vector.load %arg1[%c0, %c0_0] : memref<2x768xf32, #tpu.memory_space<vmem>>, vector<2x768xf32>
    %c0_1 = arith.constant 0 : index
    %c0_2 = arith.constant 0 : index
    %1 = vector.load %arg2[%c0_1, %c0_2] : memref<2x768xf32, #tpu.memory_space<vmem>>, vector<2x768xf32>
    %cst = arith.constant dense<0.000000e+00> : vector<2x2xf32>
    %2 = tpu.matmul %0, %1, %cst {dimension_numbers = #tpu.dot_dimension_numbers<[1], [1], [0], [0], [0, 0, 1, 0], [], []>} : vector<2x768xf32>, vector<2x768xf32>, vector<2x2xf32> -> vector<2x2xf32>
    %3 = tpu.iota {dimensions = array<i32: 1>} : vector<2x2xi32>
    %c0_i32 = arith.constant 0 : i32
    %4 = vector.broadcast %c0_i32 : i32 to vector<2x2xi32>
    %5 = arith.cmpi eq, %3, %4 : vector<2x2xi32>
    %c0_3 = arith.constant 0 : index
    %6 = memref.load %arg3[%c0_3] : memref<2xf32, #tpu.memory_space<smem>>
    %c1 = arith.constant 1 : index
    %7 = memref.load %arg3[%c1] : memref<2xf32, #tpu.memory_space<smem>>
    %8 = vector.broadcast %6 : f32 to vector<2x2xf32>
    %9 = vector.broadcast %7 : f32 to vector<2x2xf32>
    %10 = arith.select %5, %8, %9 : vector<2x2xi1>, vector<2x2xf32>
    %11 = arith.addf %2, %10 : vector<2x2xf32>
    %c0_4 = arith.constant 0 : index
    %c0_5 = arith.constant 0 : index
    %12 = vector.load %arg4[%c0_4, %c0_5] : memref<2x2xf32, #tpu.memory_space<vmem>>, vector<2x2xf32>
    tpu.vector_store %arg4[%c0_4, %c0_5], %11 {strides = array<i32>} : memref<2x2xf32, #tpu.memory_space<vmem>>, vector<2x2xf32>,
    return
  }
  func.func @transform_0(%arg0: i32) -> (i32, i32) {
    %c0_i32 = arith.constant 0 : i32
    %c0_i32_0 = arith.constant 0 : i32
    return %arg0, %c0_i32 : i32, i32
  }
  func.func @transform_1(%arg0: i32) -> (i32, i32) {
    %c0_i32 = arith.constant 0 : i32
    %c0_i32_0 = arith.constant 0 : i32
    %c0_i32_1 = arith.constant 0 : i32
    return %c0_i32, %c0_i32_0 : i32, i32
  }
  func.func @transform_2(%arg0: i32) -> i32 {
    %c0_i32 = arith.constant 0 : i32
    %c0_i32_0 = arith.constant 0 : i32
    return %c0_i32 : i32
  }
  func.func @transform_3(%arg0: i32) -> (i32, i32) {
    %c0_i32 = arith.constant 0 : i32
    %c0_i32_0 = arith.constant 0 : i32
    return %arg0, %c0_i32 : i32, i32
  }
}

</mosaic_0001>

<bundles_post_ra>
// kernel: tpu_custom_call.1
= control target key start
LH: loop header
LB: loop body
LE: loop exit
PB: predicated region body
PF: predicated region fallthrough
CT: control target
= control target key end

     0   :  { %8 = vsyncpa [#allocation3], 0  ;;  %s486_s0 = inlined_call_operand.hbm [shape: f32[2,768], index: 0, kind: input, shape index: {}]   ;;  %s487_s1 = inlined_call_operand.hbm [shape: f32[2,768], index: 1, kind: input, shape index: {}]   ;;  %s488_s2 = inlined_call_operand.vmem [shape: f32[2], index: 2, kind: input, shape index: {}]   ;;  %s489_s3 = inlined_call_operand.hbm [shape: f32[2,2], index: 3, kind: output, shape index: {}]  }
   0x1   :  { %9 = vsyncpa [#allocation7], 0 }
   0x2   :  { %10 = vsyncpa [#allocation5], 0 }
   0x3   :  { %11 = vsyncpa [#allocation4], 0  ;;  %s449_s12 = smov [#allocation2]   ;;  %s450_s14 = smov [#allocation6]  }
   0x4   :  { %s18_s13 = sshll.u32 %s449_s12, 4  ;;  %s28_s15 = sshll.u32 %s450_s14, 4  ;;  %s19_s13 = int_to_ptr.vmem [resolvable:$true] %s18_s13  ;;  %s29_s15 = int_to_ptr.vmem [resolvable:$true] %s28_s15 }
   0x5   :  { %s377_s16 = scalar_lea.vmem %s19_s13, 192  ;;  %p382_p1 = scmp.lt.s32.totalorder %s19_s13, %s19_s13 }
   0x6   :  { %p378_p0 = scmp.ne.s32.totalorder %s19_s13, %s377_s16  ;;  %p383_p2 = scmp.lt.s32.totalorder %s377_s16, %s377_s16 }
   0x8   :  { %p384_p3 = por %p383_p2, %p382_p1 }
   0xa   :  { %p385_p4 = pnand %p384_p3, %p378_p0 }
   0xc   :  { %388 = shalt.err (!%p385_p4)
}
   0xd   :  { %21 = dma.hbm_to_vmem [thread:$0]  %s486_s0, 192, %s19_s13, [#allocation3]  }
   0xe   :  { %s397_s19 = scalar_lea.vmem %s29_s15, 192  ;;  %p402_p6 = scmp.lt.s32.totalorder %s29_s15, %s29_s15 }
   0xf   :  { %p398_p5 = scmp.ne.s32.totalorder %s29_s15, %s397_s19  ;;  %p403_p7 = scmp.lt.s32.totalorder %s397_s19, %s397_s19 }
  0x11   :  { %p404_p8 = por %p403_p7, %p402_p6 }
  0x13   :  { %p405_p9 = pnand %p404_p8, %p398_p5 }
  0x15   :  { %408 = shalt.err (!%p405_p9)
}
  0x16   :  { %31 = dma.hbm_to_vmem [thread:$0]  %s487_s1, 192, %s29_s15, [#allocation7]  }
  0x17   :  { %s38_s24 = sshll.u32 %s488_s2, 4  ;;  %s39_s24 = int_to_ptr.vmem [resolvable:$true] %s38_s24 }
  0x18   :  { %s409_s25 = scalar_lea.vmem %s39_s24, 16  ;;  %p414_p11 = scmp.lt.s32.totalorder %s39_s24, %s39_s24 }
  0x19   :  { %p410_p10 = scmp.ne.s32.totalorder %s39_s24, %s409_s25  ;;  %p415_p12 = scmp.lt.s32.totalorder %s409_s25, %s409_s25 }
  0x1b   :  { %p416_p13 = por %p415_p12, %p414_p11 }
  0x1d   :  { %p417_p0 = pnand %p416_p13, %p410_p10 }
  0x1f   :  { %420 = shalt.err (!%p417_p0)
}
  0x20   :  { %s451_s0 = smov [#allocation8]  }
  0x21   :  { %41 = dma.vmem_to_smem %s39_s24, 16, %s451_s0, [#allocation5]  }
  0x22   :  { %441 = dma.done.wait [#allocation3], 192  }
  0x23   :  { %442 = vsyncadd [#allocation3], 4294967104 }
  0x24   :  { %443 = dma.done.wait [#allocation7], 192  }
  0x25   :  { %444 = vsyncadd [#allocation7], 4294967104 }
  0x26   :  { %445 = dma.done.wait [#allocation5], 16  }
  0x27   :  { %446 = vsyncadd [#allocation5], 4294967280 }
  0x28   :  { %51 = sfence }
  0x29   :  { %v54_v0 = vld [vmem:[#allocation6] sm:$0xff]  ;;  %v56_v1 = vlaneseq  ;;  %v52_v2 = vld [vmem:[#allocation2] sm:$0xff]  ;;  %v452_v3 = vmov 1983009808   ;;  %s59_s1 = sld [smem:[#allocation8]]  ;;  %s453_s26 = smov [#allocation9]  }
  0x2a   :  { %v68_v4 = vunpack.c.l.s4 %v452_v3  ;;  %v99_v7 = vcombine.high %v54_v0, %v54_v0  ;;  %v66_v8 = vcombine.high %v52_v2, %v52_v2  ;;  %v361_v14 = vld.sshfl [vmem:[#allocation6 + $0x8] sm:$0x33 pattern:$0x76325410]  ;;  %s359_s2 = sld [smem:[#allocation8 + $0x1]]  ;;  %s348_s27 = sshll.u32 %s453_s26, 4  ;;  %s349_s27 = int_to_ptr.vmem [resolvable:$true] %s348_s27 }
  0x2b   :  { %v71_v5 = vshrl.u32 %v56_v1, 7  ;;  %v360_v19 = vld.sshfl [vmem:[#allocation2 + $0x8] sm:$0x33 pattern:$0x76325410]  ;;  %v123_v20 = vcombine.high %v361_v14, %v361_v14  ;;  %v57_v22 = vand.u32 127, %v56_v1  ;;  %p426_p2 = scmp.lt.s32.totalorder %s349_s27, %s349_s27 }
  0x2c   :  { %v69_v6 = vunpack.c.0.s8 %v68_v4  ;;  %v90_v21 = vcombine.high %v360_v19, %v360_v19  ;;  %vm340_vm1 = vcmask 9216   ;;  %s421_s28 = scalar_lea.vmem %s349_s27, 32 }
  0x2d   :  { %vm58_vm0 = vcmp.eq.s32.totalorder %v57_v22, 0  ;;  %p422_p1 = scmp.ne.s32.totalorder %s349_s27, %s421_s28  ;;  %p427_p3 = scmp.lt.s32.totalorder %s421_s28, %s421_s28 }
  0x2e   :  { %v72_v9 = vsub.s32 %v69_v6, %v71_v5 }
  0x2f   :  { %v61_v23 = vstv %s59_s1  ;;  %p428_p4 = por %p427_p3, %p426_p2 }
  0x30   :  { %v106_v10 = vrot.slane %v54_v0, %v72_v9  ;;  %v113_v11 = vrot.slane %v99_v7, %v72_v9  ;;  %v73_v12 = vrot.slane %v52_v2, %v72_v9  ;;  %v80_v13 = vrot.slane %v66_v8, %v72_v9 }
  0x31   :  { %v62_v24 = vstv %s359_s2  ;;  %p429_p5 = pnand %p428_p4, %p422_p1 }
  0x32   :  { %v114_v15 = vcombine.high %v106_v10, %v106_v10  ;;  %v115_v16 = vcombine.high %v113_v11, %v113_v11  ;;  %v81_v17 = vcombine.high %v73_v12, %v73_v12  ;;  %v82_v18 = vcombine.high %v80_v13, %v80_v13 }
  0x33   :  { %v63_v25 = vsel %vm58_vm0, %v61_v23, %v62_v24 }
  0x34   :  { %160 = vmatprep.subr.mxu0 %v114_v15  ;;  %230 = vmatprep.subr.mxu1 %v115_v16 }
  0x35   :  { %161 = vmatpush1.xpose.msra.mxu0 %v106_v10  ;;  %231 = vmatpush1.xpose.msra.mxu1 %v113_v11 }
  0x36   :  { %194 = vmatprep.mubr.f32.mxu0 %v81_v17  ;;  %264 = vmatprep.mubr.f32.mxu1 %v82_v18 }
  0x37   :  { %300 = vmatprep.subr.mxu0 %v123_v20 }
  0x38   :  { %195 = vmatmul.mubr.f32.vlgmr.msra.gmra.mxu0 %v73_v12  ;;  %265 = vmatmul.mubr.f32.vlgmr.msra.gmra.mxu1 %v80_v13 }
  0x39   :  { %301 = vmatpush1.xpose.msra.mxu0 %v361_v14  ;;  %334 = vmatprep.mubr.f32.mxu0 %v90_v21 }
  0x3c   :  { %335 = vmatmul.mubr.f32.vlgmr.msra.gmra.mxu0 %v360_v19 }
  0xf8   :  { %v196_v26 = vpop.f32.mrf.mxu0  ;;  %v266_v27 = vpop.f32.mrf.mxu1 }
  0xf9   :  { %v197_v28 = vadd.f32 %v196_v26, %v63_v25 }
  0xfa   :  { %v198_v29 = vpop.f32.mrf.mxu0  ;;  %v268_v30 = vpop.f32.mrf.mxu1 }
  0xfb   :  { %v267_v31 = vadd.f32 %v266_v27, %v197_v28 }
  0xfc   :  { %v336_v32 = vpop.f32.mrf.mxu0 }
  0xfd   :  { %v337_v33 = vadd.f32 %v336_v32, %v267_v31 }
  0xfe   :  { %v338_v34 = vpop.f32.mrf.mxu0 }
  0xff   :  { %341 = vst.msk [vmem:[#allocation9] sm:$0x3] %vm340_vm1, %v337_v33 }
 0x100   :  { %432 = shalt.err (!%p429_p5)
}
 0x101   :  { %351 = dma.vmem_to_hbm [thread:$0]  %s349_s27, 32, %s489_s3, [#allocation4]  }
 0x102   :  { %447 = dma.done.wait [#allocation4], 32  }
 0x103   :  { %448 = vsyncadd [#allocation4], 4294967264 }
 0x104   :  { %355 = vsyncpa [#allocation3], 1 }
 0x105   :  { %356 = vsyncpa [#allocation7], 1 }
 0x106   :  { %357 = vsyncpa [#allocation4], 1 }
 0x107   :  { %358 = vsyncpa [#allocation5], 1 }

</bundles_post_ra>
